<compile_context>
chip_gen: v6e
topology: v6e:2x2x1
jax: 0.10.0
libtpu: 0.0.40
codegen_flags: <defaults>
</compile_context>

<pallas_src>
import jax
import jax.numpy as jnp
from jax.experimental import pallas as pl
from jax.experimental.pallas import tpu as pltpu

LANE = 128
SUBLANE = 8


def _round_up(v, m):
    return (v + m - 1) // m * m


def _pad2d(a, rows, cols):
    r, c = a.shape
    return jnp.pad(a, ((0, rows - r), (0, cols - c)))


# ----------------------------------------------------------------------------
# Pallas kernels
# ----------------------------------------------------------------------------
def _branch_kernel(adj_ref, x_ref, xr_ref, pool_ref, rsel_ref,
                   w1_ref, b1_ref, w2a_ref, w2b_ref, b2_ref, out_ref):
    """One BiGCN branch. grid axis 0 selects {0: TD, 1: BU}.

    adj  : [1, N, N]   bf16 symmetric-normalized adjacency for this branch
    x    : [N, Fp]     bf16 node features (zero-padded to lane width)
    xr   : [N, Fp]     bf16 relu(x[rootindex[batch]])  (root_extend of conv1 in)
    pool : [Bp, N]     f32  scatter_mean pooling matrix
    rsel : [Bp, N]     f32  one-hot root-row selector (rsel[g, rootindex[g]]=1)
    w1   : [1, Fp, Hp] bf16 ; b1 : [1, 1, Hp] f32
    w2a  : [1, Hp, Op] bf16 (conv2 weight rows hitting conv1 output)
    w2b  : [1, Fp, Op] bf16 (conv2 weight rows hitting root_extend)
    b2   : [1, 1, Op]  f32
    out  : [1, Bp, Op + Hp] f32   ([pooled h2 | pooled root_extend(h1)])
    """
    op = w2a_ref.shape[-1]
    adj = adj_ref[0]
    x = x_ref[...]

    # conv1: A_hat @ (X @ W1) + b1   (bf16 MXU, f32 accumulation)
    xw1 = jnp.dot(x, w1_ref[0], preferred_element_type=jnp.float32)
    h1 = jnp.dot(adj, xw1.astype(jnp.bfloat16),
                 preferred_element_type=jnp.float32) + b1_ref[0]

    # conv2 on relu(cat([h1 | re1])): split matmul instead of a lane concat.
    # TODO(synk): training-mode dropout not reproduced (eval semantics).
    z = (jnp.dot(jnp.maximum(h1, 0.0).astype(jnp.bfloat16), w2a_ref[0],
                 preferred_element_type=jnp.float32)
         + jnp.dot(xr_ref[...], w2b_ref[0],
                   preferred_element_type=jnp.float32))
    h2 = jnp.maximum(
        jnp.dot(adj, z.astype(jnp.bfloat16),
                preferred_element_type=jnp.float32) + b2_ref[0], 0.0)

    # scatter_mean(cat([h2 | re2])) == [pool @ h2 | rsel @ h1]
    # (pool @ one_hot(batch) == identity, so the pooled second root_extend is
    #  exactly the root row of the pre-relu conv1 output.)
    out_ref[0, :, :op] = jnp.dot(pool_ref[...], h2,
                                 preferred_element_type=jnp.float32)
    out_ref[0, :, op:] = jnp.dot(rsel_ref[...], h1,
                                 preferred_element_type=jnp.float32)


def _head_kernel(br_ref, wbu_ref, wtd_ref, b_ref, out_ref):
    """cat(BU, TD) @ fc + b -> log_softmax, as a split matmul (no lane concat).

    br : [2, Bp, Dp] f32 pooled branch outputs (0: TD, 1: BU)
    wbu/wtd : [Dp, Cp] f32 ; b : [1, Cp] f32 (padded classes biased to -1e30)
    out : [Bp, Cp] f32
    """
    td = br_ref[0]
    bu = br_ref[1]
    logits = (jnp.dot(bu, wbu_ref[...], preferred_element_type=jnp.float32)
              + jnp.dot(td, wtd_ref[...], preferred_element_type=jnp.float32)
              + b_ref[...])
    m = jnp.max(logits, axis=1, keepdims=True)
    shifted = logits - m
    lse = jnp.log(jnp.sum(jnp.exp(shifted), axis=1, keepdims=True))
    out_ref[...] = shifted - lse


# ----------------------------------------------------------------------------
# Wrappers (pallas_call glue)
# ----------------------------------------------------------------------------
_VMEM = pl.BlockSpec(memory_space=pltpu.MemorySpace.VMEM)
_VMEM_LIMIT = 32 * 1024 * 1024


def bigcn_branches(adj_st, x_p, xr_p, pool, rsel,
                   w1_st, b1_st, w2a_st, w2b_st, b2_st):
    n, fp = x_p.shape
    bp = pool.shape[0]
    hp = b1_st.shape[-1]
    op = b2_st.shape[-1]
    dp = op + hp
    in_specs = [
        pl.BlockSpec((1, n, n), lambda b: (b, 0, 0)),     # adj (per branch)
        pl.BlockSpec((n, fp), lambda b: (0, 0)),          # x   (shared)
        pl.BlockSpec((n, fp), lambda b: (0, 0)),          # xr  (shared)
        pl.BlockSpec((bp, n), lambda b: (0, 0)),          # pool (shared)
        pl.BlockSpec((bp, n), lambda b: (0, 0)),          # rsel (shared)
        pl.BlockSpec((1, fp, hp), lambda b: (b, 0, 0)),   # w1
        pl.BlockSpec((1, 1, hp), lambda b: (b, 0, 0)),    # b1
        pl.BlockSpec((1, hp, op), lambda b: (b, 0, 0)),   # w2a
        pl.BlockSpec((1, fp, op), lambda b: (b, 0, 0)),   # w2b
        pl.BlockSpec((1, 1, op), lambda b: (b, 0, 0)),    # b2
    ]
    return pl.pallas_call(
        _branch_kernel,
        out_shape=jax.ShapeDtypeStruct((2, bp, dp), jnp.float32),
        grid=(2,),
        in_specs=in_specs,
        out_specs=pl.BlockSpec((1, bp, dp), lambda b: (b, 0, 0)),
        compiler_params=pltpu.CompilerParams(
            dimension_semantics=("parallel",),
            vmem_limit_bytes=_VMEM_LIMIT),
    )(adj_st, x_p, xr_p, pool, rsel, w1_st, b1_st, w2a_st, w2b_st, b2_st)


def bigcn_head(branch_out, w_bu, w_td, b_fc):
    bp = branch_out.shape[1]
    cp = w_bu.shape[1]
    return pl.pallas_call(
        _head_kernel,
        out_shape=jax.ShapeDtypeStruct((bp, cp), jnp.float32),
        in_specs=[_VMEM] * 4,
        out_specs=_VMEM,
        compiler_params=pltpu.CompilerParams(vmem_limit_bytes=_VMEM_LIMIT),
    )(branch_out, w_bu, w_td, b_fc)


def network_forward(params, x, td_edge_index, bu_edge_index, batch, rootindex,
                    num_graphs):
    n, f = x.shape
    h = params["td_w1"].shape[1]
    o = params["td_w2"].shape[1]
    c = params["fc_w"].shape[1]
    fp, hp, op, cp = (_round_up(d, LANE) for d in (f, h, o, c))
    bp = _round_up(num_graphs, SUBLANE)

    # --- graph preprocessing (plain JAX, tiny) ---
    adj_st = jnp.stack([normalized_adj(td_edge_index, n),
                        normalized_adj(bu_edge_index, n)]).astype(jnp.bfloat16)

    x_pad = _pad2d(x, n, fp)
    xr_p = jnp.maximum(x_pad[rootindex[batch]], 0.0).astype(jnp.bfloat16)
    x_p = x_pad.astype(jnp.bfloat16)

    counts = jnp.zeros((num_graphs,), jnp.float32).at[batch].add(1.0)
    counts = jnp.maximum(counts, 1.0)
    counts_p = jnp.concatenate(
        [counts, jnp.ones((bp - num_graphs,), jnp.float32)])
    pool = jax.nn.one_hot(batch, bp, dtype=jnp.float32).T / counts_p[:, None]
    rsel = jnp.zeros((bp, n), jnp.float32).at[
        jnp.arange(num_graphs), rootindex].set(1.0)

    # --- stacked / padded / bf16 weights (axis 0: 0=TD, 1=BU) ---
    w1_st = jnp.stack([_pad2d(params["td_w1"], fp, hp),
                       _pad2d(params["bu_w1"], fp, hp)]).astype(jnp.bfloat16)
    b1_st = jnp.stack([_pad2d(params["td_b1"], 1, hp),
                       _pad2d(params["bu_b1"], 1, hp)])
    w2a_st = jnp.stack([_pad2d(params["td_w2"][:h], hp, op),
                        _pad2d(params["bu_w2"][:h], hp, op)]).astype(jnp.bfloat16)
    w2b_st = jnp.stack([_pad2d(params["td_w2"][h:], fp, op),
                        _pad2d(params["bu_w2"][h:], fp, op)]).astype(jnp.bfloat16)
    b2_st = jnp.stack([_pad2d(params["td_b2"], 1, op),
                       _pad2d(params["bu_b2"], 1, op)])

    def pad_fc(block):  # block: [o+h, c] -> [op+hp, cp] matching branch layout
        w = jnp.zeros((op + hp, cp), jnp.float32)
        w = w.at[:o, :c].set(block[:o])
        w = w.at[op:op + h, :c].set(block[o:])
        return w

    w_bu = pad_fc(params["fc_w"][:o + h])
    w_td = pad_fc(params["fc_w"][o + h:])
    b_fc = jnp.full((1, cp), -1e30, jnp.float32).at[:, :c].set(params["fc_b"][0])

    branch_out = bigcn_branches(adj_st, x_p, xr_p, pool, rsel,
                                w1_st, b1_st, w2a_st, w2b_st, b2_st)
    head_out = bigcn_head(branch_out, w_bu, w_td, b_fc)
    return head_out[:num_graphs, :c]


# ----------------------------------------------------------------------------
# Plain-JAX helpers (graph preprocessing + f32 reference)
# ----------------------------------------------------------------------------
def normalized_adj(edge_index, num_nodes):
    """Dense GCNConv normalization: add self loops, D^-1/2 (A+I) D^-1/2."""
    src, dst = edge_index[0], edge_index[1]
    loop = jnp.arange(num_nodes, dtype=src.dtype)
    src = jnp.concatenate([src, loop])
    dst = jnp.concatenate([dst, loop])
    ones = jnp.ones(src.shape, jnp.float32)
    deg = jnp.zeros((num_nodes,), jnp.float32).at[dst].add(ones)
    dinv = jnp.where(deg > 0, 1.0 / jnp.sqrt(deg), 0.0)
    norm = dinv[src] * dinv[dst]
    return jnp.zeros((num_nodes, num_nodes), jnp.float32).at[dst, src].add(norm)


def _branch_ref(adj, x, root_mat, pool_mat, w1, b1, w2, b2):
    h1 = adj @ (x @ w1) + b1
    cat1 = jnp.maximum(jnp.concatenate([h1, root_mat @ x], axis=1), 0.0)
    h2 = jnp.maximum(adj @ (cat1 @ w2) + b2, 0.0)
    cat2 = jnp.concatenate([h2, root_mat @ h1], axis=1)
    return pool_mat @ cat2


def network_ref(params, x, td_ei, bu_ei, batch, rootindex, num_graphs):
    N = x.shape[0]
    root_mat = jax.nn.one_hot(rootindex[batch], N, dtype=jnp.float32)
    counts = jnp.zeros((num_graphs,), jnp.float32).at[batch].add(1.0)
    pool_mat = jax.nn.one_hot(batch, num_graphs, dtype=jnp.float32).T / counts[:, None]
    td = _branch_ref(normalized_adj(td_ei, N), x, root_mat, pool_mat,
                     params["td_w1"], params["td_b1"], params["td_w2"], params["td_b2"])
    bu = _branch_ref(normalized_adj(bu_ei, N), x, root_mat, pool_mat,
                     params["bu_w1"], params["bu_b1"], params["bu_w2"], params["bu_b2"])
    logits = jnp.concatenate([bu, td], axis=1) @ params["fc_w"] + params["fc_b"]
    return jax.nn.log_softmax(logits, axis=1)


def init_params(key, in_feats, hid_feats, out_feats):
    ks = jax.random.split(key, 10)
    s = 0.1
    return {
        "td_w1": s * jax.random.normal(ks[0], (in_feats, hid_feats), jnp.float32),
        "td_b1": s * jax.random.normal(ks[1], (1, hid_feats), jnp.float32),
        "td_w2": s * jax.random.normal(ks[2], (hid_feats + in_feats, out_feats), jnp.float32),
        "td_b2": s * jax.random.normal(ks[3], (1, out_feats), jnp.float32),
        "bu_w1": s * jax.random.normal(ks[4], (in_feats, hid_feats), jnp.float32),
        "bu_b1": s * jax.random.normal(ks[5], (1, hid_feats), jnp.float32),
        "bu_w2": s * jax.random.normal(ks[6], (hid_feats + in_feats, out_feats), jnp.float32),
        "bu_b2": s * jax.random.normal(ks[7], (1, out_feats), jnp.float32),
        "fc_w": s * jax.random.normal(ks[8], ((out_feats + hid_feats) * 2, 4), jnp.float32),
        "fc_b": s * jax.random.normal(ks[9], (1, 4), jnp.float32),
    }


# ----------------------------------------------------------------------------
if __name__ == "__main__":
    in_feats, hid_feats, out_feats = 16, 16, 16
    num_graphs = 2
    nodes_per_graph = 8
    N = num_graphs * nodes_per_graph  # 16 nodes total

    key = jax.random.PRNGKey(0)
    k_x, k_p = jax.random.split(key)
    x = jax.random.normal(k_x, (N, in_feats), jnp.float32)

    # Two small trees (root = node 0 and node 8); TD = parent->child, BU = reversed.
    parents = jnp.array([0, 0, 1, 1, 2, 2, 3,
                         8, 8, 9, 9, 10, 10, 11], jnp.int32)
    children = jnp.array([1, 2, 3, 4, 5, 6, 7,
                          9, 10, 11, 12, 13, 14, 15], jnp.int32)
    td_edge_index = jnp.stack([parents, children])   # data.edge_index
    bu_edge_index = jnp.stack([children, parents])   # data.BU_edge_index
    batch = jnp.concatenate([jnp.zeros(nodes_per_graph, jnp.int32),
                             jnp.ones(nodes_per_graph, jnp.int32)])
    rootindex = jnp.array([0, 8], jnp.int32)

    params = init_params(k_p, in_feats, hid_feats, out_feats)

    out = network_forward(params, x, td_edge_index, bu_edge_index, batch,
                          rootindex, num_graphs)
    out = jax.block_until_ready(out)

    ref = network_ref(params, x, td_edge_index, bu_edge_index, batch,
                      rootindex, num_graphs)
    assert out.shape == (num_graphs, 4)
    assert jnp.allclose(out, ref, rtol=2e-2, atol=2e-2), "mismatch vs JAX reference"

    print("KERNEL_OK")
</pallas_src>

<mosaic_0001>
module attributes {stable_mosaic.version = 11 : i64} {
  func.func @_branch_kernel(%arg0: i32, %arg1: memref<1x16x16xbf16, #tpu.memory_space<vmem>>, %arg2: memref<16x128xbf16, #tpu.memory_space<vmem>>, %arg3: memref<16x128xbf16, #tpu.memory_space<vmem>>, %arg4: memref<8x16xf32, #tpu.memory_space<vmem>>, %arg5: memref<8x16xf32, #tpu.memory_space<vmem>>, %arg6: memref<1x128x128xbf16, #tpu.memory_space<vmem>>, %arg7: memref<1x1x128xf32, #tpu.memory_space<vmem>>, %arg8: memref<1x128x128xbf16, #tpu.memory_space<vmem>>, %arg9: memref<1x128x128xbf16, #tpu.memory_space<vmem>>, %arg10: memref<1x1x128xf32, #tpu.memory_space<vmem>>, %arg11: memref<1x8x256xf32, #tpu.memory_space<vmem>>) attributes {dimension_semantics = [#tpu.dimension_semantics<parallel>], iteration_bounds = array<i64: 2>, scalar_prefetch = 0 : i64, scratch_operands = 0 : i64, tpu.core_type = #tpu.core_type<tc>, window_params = [{transform_indices = @transform_0, window_bounds = array<i64: 1, 16, 16>}, {pipeline_mode = #tpu.pipeline_mode<synchronous>, transform_indices = @transform_1, window_bounds = array<i64: 16, 128>}, {pipeline_mode = #tpu.pipeline_mode<synchronous>, transform_indices = @transform_2, window_bounds = array<i64: 16, 128>}, {pipeline_mode = #tpu.pipeline_mode<synchronous>, transform_indices = @transform_3, window_bounds = array<i64: 8, 16>}, {pipeline_mode = #tpu.pipeline_mode<synchronous>, transform_indices = @transform_4, window_bounds = array<i64: 8, 16>}, {transform_indices = @transform_5, window_bounds = array<i64: 1, 128, 128>}, {transform_indices = @transform_6, window_bounds = array<i64: 1, 1, 128>}, {transform_indices = @transform_7, window_bounds = array<i64: 1, 128, 128>}, {transform_indices = @transform_8, window_bounds = array<i64: 1, 128, 128>}, {transform_indices = @transform_9, window_bounds = array<i64: 1, 1, 128>}, {transform_indices = @transform_10, window_bounds = array<i64: 1, 8, 256>}]} {
    %c0 = arith.constant 0 : index
    %c0_0 = arith.constant 0 : index
    %c0_1 = arith.constant 0 : index
    %0 = vector.load %arg1[%c0, %c0_0, %c0_1] : memref<1x16x16xbf16, #tpu.memory_space<vmem>>, vector<1x16x16xbf16>
    %1 = vector.shape_cast %0 : vector<1x16x16xbf16> to vector<16x16xbf16>
    %c0_2 = arith.constant 0 : index
    %c0_3 = arith.constant 0 : index
    %2 = vector.load %arg2[%c0_2, %c0_3] : memref<16x128xbf16, #tpu.memory_space<vmem>>, vector<16x128xbf16>
    %c0_4 = arith.constant 0 : index
    %c0_5 = arith.constant 0 : index
    %c0_6 = arith.constant 0 : index
    %3 = vector.load %arg6[%c0_4, %c0_5, %c0_6] : memref<1x128x128xbf16, #tpu.memory_space<vmem>>, vector<1x128x128xbf16>
    %4 = vector.shape_cast %3 : vector<1x128x128xbf16> to vector<128x128xbf16>
    %cst = arith.constant dense<0.000000e+00> : vector<16x128xf32>
    %5 = tpu.matmul %2, %4, %cst {dimension_numbers = #tpu.dot_dimension_numbers<[1], [0], [0], [1], [0, 0, 1, 1], [], []>} : vector<16x128xbf16>, vector<128x128xbf16>, vector<16x128xf32> -> vector<16x128xf32>
    %6 = arith.truncf %5 : vector<16x128xf32> to vector<16x128xbf16>
    %cst_7 = arith.constant dense<0.000000e+00> : vector<16x128xf32>
    %7 = tpu.matmul %1, %6, %cst_7 {dimension_numbers = #tpu.dot_dimension_numbers<[1], [0], [0], [1], [0, 0, 1, 1], [], []>} : vector<16x16xbf16>, vector<16x128xbf16>, vector<16x128xf32> -> vector<16x128xf32>
    %c0_8 = arith.constant 0 : index
    %c0_9 = arith.constant 0 : index
    %c0_10 = arith.constant 0 : index
    %8 = vector.load %arg7[%c0_8, %c0_9, %c0_10] : memref<1x1x128xf32, #tpu.memory_space<vmem>>, vector<1x1x128xf32>
    %9 = vector.shape_cast %8 : vector<1x1x128xf32> to vector<1x128xf32>
    %10 = vector.broadcast %9 : vector<1x128xf32> to vector<16x128xf32>
    %11 = arith.addf %7, %10 : vector<16x128xf32>
    %cst_11 = arith.constant 0.000000e+00 : f32
    %12 = vector.broadcast %cst_11 : f32 to vector<16x128xf32>
    %13 = arith.maximumf %11, %12 : vector<16x128xf32>
    %14 = arith.truncf %13 : vector<16x128xf32> to vector<16x128xbf16>
    %c0_12 = arith.constant 0 : index
    %c0_13 = arith.constant 0 : index
    %c0_14 = arith.constant 0 : index
    %15 = vector.load %arg8[%c0_12, %c0_13, %c0_14] : memref<1x128x128xbf16, #tpu.memory_space<vmem>>, vector<1x128x128xbf16>
    %16 = vector.shape_cast %15 : vector<1x128x128xbf16> to vector<128x128xbf16>
    %cst_15 = arith.constant dense<0.000000e+00> : vector<16x128xf32>
    %17 = tpu.matmul %14, %16, %cst_15 {dimension_numbers = #tpu.dot_dimension_numbers<[1], [0], [0], [1], [0, 0, 1, 1], [], []>} : vector<16x128xbf16>, vector<128x128xbf16>, vector<16x128xf32> -> vector<16x128xf32>
    %c0_16 = arith.constant 0 : index
    %c0_17 = arith.constant 0 : index
    %18 = vector.load %arg3[%c0_16, %c0_17] : memref<16x128xbf16, #tpu.memory_space<vmem>>, vector<16x128xbf16>
    %c0_18 = arith.constant 0 : index
    %c0_19 = arith.constant 0 : index
    %c0_20 = arith.constant 0 : index
    %19 = vector.load %arg9[%c0_18, %c0_19, %c0_20] : memref<1x128x128xbf16, #tpu.memory_space<vmem>>, vector<1x128x128xbf16>
    %20 = vector.shape_cast %19 : vector<1x128x128xbf16> to vector<128x128xbf16>
    %cst_21 = arith.constant dense<0.000000e+00> : vector<16x128xf32>
    %21 = tpu.matmul %18, %20, %cst_21 {dimension_numbers = #tpu.dot_dimension_numbers<[1], [0], [0], [1], [0, 0, 1, 1], [], []>} : vector<16x128xbf16>, vector<128x128xbf16>, vector<16x128xf32> -> vector<16x128xf32>
    %22 = arith.addf %17, %21 : vector<16x128xf32>
    %23 = arith.truncf %22 : vector<16x128xf32> to vector<16x128xbf16>
    %cst_22 = arith.constant dense<0.000000e+00> : vector<16x128xf32>
    %24 = tpu.matmul %1, %23, %cst_22 {dimension_numbers = #tpu.dot_dimension_numbers<[1], [0], [0], [1], [0, 0, 1, 1], [], []>} : vector<16x16xbf16>, vector<16x128xbf16>, vector<16x128xf32> -> vector<16x128xf32>
    %c0_23 = arith.constant 0 : index
    %c0_24 = arith.constant 0 : index
    %c0_25 = arith.constant 0 : index
    %25 = vector.load %arg10[%c0_23, %c0_24, %c0_25] : memref<1x1x128xf32, #tpu.memory_space<vmem>>, vector<1x1x128xf32>
    %26 = vector.shape_cast %25 : vector<1x1x128xf32> to vector<1x128xf32>
    %27 = vector.broadcast %26 : vector<1x128xf32> to vector<16x128xf32>
    %28 = arith.addf %24, %27 : vector<16x128xf32>
    %cst_26 = arith.constant 0.000000e+00 : f32
    %29 = vector.broadcast %cst_26 : f32 to vector<16x128xf32>
    %30 = arith.maximumf %28, %29 : vector<16x128xf32>
    %c0_27 = arith.constant 0 : index
    %c0_28 = arith.constant 0 : index
    %31 = vector.load %arg4[%c0_27, %c0_28] : memref<8x16xf32, #tpu.memory_space<vmem>>, vector<8x16xf32>
    %cst_29 = arith.constant dense<0.000000e+00> : vector<8x128xf32>
    %32 = tpu.matmul %31, %30, %cst_29 {dimension_numbers = #tpu.dot_dimension_numbers<[1], [0], [0], [1], [0, 0, 1, 1], [], []>} : vector<8x16xf32>, vector<16x128xf32>, vector<8x128xf32> -> vector<8x128xf32>
    %c0_30 = arith.constant 0 : index
    %c0_31 = arith.constant 0 : index
    %c0_32 = arith.constant 0 : index
    %33 = vector.load %arg11[%c0_30, %c0_31, %c0_32] : memref<1x8x256xf32, #tpu.memory_space<vmem>>, vector<1x8x128xf32>
    %34 = vector.shape_cast %33 : vector<1x8x128xf32> to vector<8x128xf32>
    %35 = vector.shape_cast %32 : vector<8x128xf32> to vector<1x8x128xf32>
    tpu.vector_store %arg11[%c0_30, %c0_31, %c0_32], %35 {strides = array<i32>} : memref<1x8x256xf32, #tpu.memory_space<vmem>>, vector<1x8x128xf32>,
    %c0_33 = arith.constant 0 : index
    %c0_34 = arith.constant 0 : index
    %36 = vector.load %arg5[%c0_33, %c0_34] : memref<8x16xf32, #tpu.memory_space<vmem>>, vector<8x16xf32>
    %cst_35 = arith.constant dense<0.000000e+00> : vector<8x128xf32>
    %37 = tpu.matmul %36, %11, %cst_35 {dimension_numbers = #tpu.dot_dimension_numbers<[1], [0], [0], [1], [0, 0, 1, 1], [], []>} : vector<8x16xf32>, vector<16x128xf32>, vector<8x128xf32> -> vector<8x128xf32>
    %c0_36 = arith.constant 0 : index
    %c0_37 = arith.constant 0 : index
    %c128 = arith.constant 128 : index
    %38 = vector.load %arg11[%c0_36, %c0_37, %c128] : memref<1x8x256xf32, #tpu.memory_space<vmem>>, vector<1x8x128xf32>
    %39 = vector.shape_cast %38 : vector<1x8x128xf32> to vector<8x128xf32>
    %40 = vector.shape_cast %37 : vector<8x128xf32> to vector<1x8x128xf32>
    tpu.vector_store %arg11[%c0_36, %c0_37, %c128], %40 {strides = array<i32>} : memref<1x8x256xf32, #tpu.memory_space<vmem>>, vector<1x8x128xf32>,
    return
  }
  func.func @transform_0(%arg0: i32) -> (i32, i32, i32) {
    %c0_i32 = arith.constant 0 : i32
    %c0_i32_0 = arith.constant 0 : i32
    %c0_i32_1 = arith.constant 0 : i32
    return %arg0, %c0_i32, %c0_i32_0 : i32, i32, i32
  }
  func.func @transform_1(%arg0: i32) -> (i32, i32) {
    %c0_i32 = arith.constant 0 : i32
    %c0_i32_0 = arith.constant 0 : i32
    %c0_i32_1 = arith.constant 0 : i32
    return %c0_i32, %c0_i32_0 : i32, i32
  }
  func.func @transform_2(%arg0: i32) -> (i32, i32) {
    %c0_i32 = arith.constant 0 : i32
    %c0_i32_0 = arith.constant 0 : i32
    %c0_i32_1 = arith.constant 0 : i32
    return %c0_i32, %c0_i32_0 : i32, i32
  }
  func.func @transform_3(%arg0: i32) -> (i32, i32) {
    %c0_i32 = arith.constant 0 : i32
    %c0_i32_0 = arith.constant 0 : i32
    %c0_i32_1 = arith.constant 0 : i32
    return %c0_i32, %c0_i32_0 : i32, i32
  }
  func.func @transform_4(%arg0: i32) -> (i32, i32) {
    %c0_i32 = arith.constant 0 : i32
    %c0_i32_0 = arith.constant 0 : i32
    %c0_i32_1 = arith.constant 0 : i32
    return %c0_i32, %c0_i32_0 : i32, i32
  }
  func.func @transform_5(%arg0: i32) -> (i32, i32, i32) {
    %c0_i32 = arith.constant 0 : i32
    %c0_i32_0 = arith.constant 0 : i32
    %c0_i32_1 = arith.constant 0 : i32
    return %arg0, %c0_i32, %c0_i32_0 : i32, i32, i32
  }
  func.func @transform_6(%arg0: i32) -> (i32, i32, i32) {
    %c0_i32 = arith.constant 0 : i32
    %c0_i32_0 = arith.constant 0 : i32
    %c0_i32_1 = arith.constant 0 : i32
    return %arg0, %c0_i32, %c0_i32_0 : i32, i32, i32
  }
  func.func @transform_7(%arg0: i32) -> (i32, i32, i32) {
    %c0_i32 = arith.constant 0 : i32
    %c0_i32_0 = arith.constant 0 : i32
    %c0_i32_1 = arith.constant 0 : i32
    return %arg0, %c0_i32, %c0_i32_0 : i32, i32, i32
  }
  func.func @transform_8(%arg0: i32) -> (i32, i32, i32) {
    %c0_i32 = arith.constant 0 : i32
    %c0_i32_0 = arith.constant 0 : i32
    %c0_i32_1 = arith.constant 0 : i32
    return %arg0, %c0_i32, %c0_i32_0 : i32, i32, i32
  }
  func.func @transform_9(%arg0: i32) -> (i32, i32, i32) {
    %c0_i32 = arith.constant 0 : i32
    %c0_i32_0 = arith.constant 0 : i32
    %c0_i32_1 = arith.constant 0 : i32
    return %arg0, %c0_i32, %c0_i32_0 : i32, i32, i32
  }
  func.func @transform_10(%arg0: i32) -> (i32, i32, i32) {
    %c0_i32 = arith.constant 0 : i32
    %c0_i32_0 = arith.constant 0 : i32
    %c0_i32_1 = arith.constant 0 : i32
    return %arg0, %c0_i32, %c0_i32_0 : i32, i32, i32
  }
}

</mosaic_0001>

<bundles_post_ra>
// kernel: tpu_custom_call.1
= control target key start
LH: loop header
LB: loop body
LE: loop exit
PB: predicated region body
PF: predicated region fallthrough
CT: control target
= control target key end

     0   :  { %s2512_s0 = inlined_call_operand.hbm [shape: bf16[2,16,16], index: 0, kind: input, shape index: {}]   ;;  %s2513_s1 = inlined_call_operand.hbm [shape: bf16[16,128], index: 1, kind: input, shape index: {}]   ;;  %s2514_s2 = inlined_call_operand.hbm [shape: bf16[16,128], index: 2, kind: input, shape index: {}]   ;;  %s2515_s3 = inlined_call_operand.hbm [shape: f32[8,16], index: 3, kind: input, shape index: {}]   ;;  %s2516_s4 = inlined_call_operand.hbm [shape: f32[8,16], index: 4, kind: input, shape index: {}]   ;;  %s2517_s5 = inlined_call_operand.hbm [shape: bf16[2,128,128], index: 5, kind: input, shape index: {}]   ;;  %s2518_s6 = inlined_call_operand.vmem [shape: f32[2,1,128], index: 6, kind: input, shape index: {}]   ;;  %s2519_s7 = inlined_call_operand.hbm [shape: bf16[2,128,128], index: 7, kind: input, shape index: {}]   ;;  %s2520_s8 = inlined_call_operand.hbm [shape: bf16[2,128,128], index: 8, kind: input, shape index: {}]   ;;  %s2521_s9 = inlined_call_operand.vmem [shape: f32[2,1,128], index: 9, kind: input, shape index: {}]   ;;  %s2522_s10 = inlined_call_operand.hbm [shape: f32[2,8,256], index: 10, kind: output, shape index: {}]  }
   0x1   :  { %2542 = sst [smem:[#allocation29_spill]] %s2513_s1 }
   0x2   :  { %2543 = sst [smem:[#allocation30_spill]] %s2514_s2 }
   0x3   :  { %2544 = sst [smem:[#allocation31_spill]] %s2515_s3 }
   0x4   :  { %2545 = sst [smem:[#allocation32_spill]] %s2517_s5 }
   0x5   :  { %2546 = sst [smem:[#allocation33_spill]] %s2522_s10 }
   0x6   :  { %15 = vsyncpa [#allocation3], 0 }
   0x7   :  { %17 = vsyncpa [#allocation3 + $0x1], 0 }
   0x8   :  { %18 = vsyncpa [#allocation6], 0 }
   0x9   :  { %19 = vsyncpa [#allocation9], 0 }
   0xa   :  { %20 = vsyncpa [#allocation12], 0 }
   0xb   :  { %22 = vsyncpa [#allocation12 + $0x1], 0 }
   0xc   :  { %23 = vsyncpa [#allocation15], 0 }
   0xd   :  { %25 = vsyncpa [#allocation15 + $0x1], 0 }
   0xe   :  { %26 = vsyncpa [#allocation4], 0 }
   0xf   :  { %28 = vsyncpa [#allocation4 + $0x1], 0  ;;  %s2074_s13 = smov 0   ;;  %s2076_s14 = smov 0  }
  0x10   :  { %s2078_s15 = smov 0   ;;  %s2080_s16 = smov 0  }
  0x11 LB: > { %2547 = sst [smem:[#allocation23_spill]] %s1992_s13  ;;  %s2095_s17 = sadd.s32 4294967295, %s2004_s16   ;;  %s2004_s16 = sphi %s2080_s16, %s2582_s16   ;;  %s2000_s15 = sphi %s2078_s15, %s2584_s15   ;;  %s1996_s14 = sphi %s2076_s14, %s2586_s14   ;;  %s1992_s13 = sphi %s2074_s13, %s2585_s13  }
  0x12   : > { %2548 = sst [smem:[#allocation24_spill]] %s2000_s15  ;;  %s1380_s18 = sadd.s32 4294967294, %s2004_s16  }
  0x13   : > { %p54_p0 = scmp.ne.s32.totalorder %s1996_s14, %s1992_s13  ;;  %p2533_p1 = scmp.eq.s32.totalorder %s2095_s17, 0 }
  0x14   : > { %p292_p2 = scmp.eq.s32.totalorder %s2095_s17, 1  ;;  %p298_p3 = scmp.eq.s32.totalorder %s1380_s18, 1 }
  0x15   : > { %p2104_p4 = por %p2533_p1, %p54_p0  ;;  %p1381_p5 = scmp.ge.s32.totalorder %s2004_s16, 1 }
  0x16   : > { %p2109_p6 = por %p298_p3, %p54_p0  ;;  %p305_p7 = scmp.lt.s32.totalorder %s2004_s16, 3 }
  0x17   : > { %s2549_s19 = scalar_select %p2104_p4, 1, 0 }
  0x18   : > { %s2550_s20 = scalar_select %p2109_p6, 1, 0 }
  0x19   : > { %p2114_p8 = pnand %p1381_p5, %p305_p7  ;;  %s2006_s22 = smov [#allocation5]  }
  0x1a   : > { %2551 = sst [smem:[#allocation25_spill]] %s2550_s20  ;;  %s317_s23 = sshll.u32 %s2006_s22, 4  ;;  %s318_s23 = int_to_ptr.vmem [resolvable:$true] %s317_s23 }
  0x1b   : > { %s2552_s21 = scalar_select %p2114_p8, 1, 0 }
  0x1c   : > { %p1601_p9 = pneg %p2114_p8  ;;  %s2007_s25 = smov [#allocation8]  }
  0x1d   : > { %s344_s26 = sshll.u32 %s2007_s25, 4  ;;  %s1719_s27 = scalar_lea.vmem %s318_s23, 128  ;;  %s345_s26 = int_to_ptr.vmem [resolvable:$true] %s344_s26 }
  0x1e   : > { %p2123_p11 = pnand %p1601_p9, %p2533_p1  ;;  %p1720_p13 = scmp.ne.s32.totalorder %s318_s23, %s1719_s27 }
  0x1f   : > { %p1727_p5 = scmp.lt.s32.totalorder %s318_s23, %s318_s23  ;;  %p1728_p7 = scmp.lt.s32.totalorder %s1719_s27, %s1719_s27 }
  0x20   : > { %s2553_s24 = scalar_select %p2123_p11, 1, 0 }
  0x21   : > { %p2534_p12 = pneg %p2123_p11  ;;  %p1729_p10 = por %p1728_p7, %p1727_p5 }
  0x23   : > { %p1722_p0 = pnand %p1720_p13, %p2534_p12 }
  0x25   : > { %p1723_p3 = pneg %p1722_p0 }
  0x27   : > { %p1730_p9 = pnand %p1729_p10, %p1723_p3 }
  0x29   : > { %1733 = shalt.err (!%p1730_p9)
}
  0x2a   : > { %s2523_s28 = smov 64   ;;  %s2525_s29 = smov 4  }
  0x2b   : > { %s2554_s1 = sld [smem:[#allocation29_spill]]  ;;  %s1745_s12 = scalar_lea.vmem %s345_s26, 128 }
  0x2c   : > { %p1746_p13 = scmp.ne.s32.totalorder %s345_s26, %s1745_s12  ;;  %p1753_p10 = scmp.lt.s32.totalorder %s345_s26, %s345_s26 }
  0x2d   : > { %p1754_p3 = scmp.lt.s32.totalorder %s1745_s12, %s1745_s12 }
  0x2e   : > { %p1748_p0 = pnand %p1746_p13, %p2534_p12 }
  0x2f   : > { %p1755_p7 = por %p1754_p3, %p1753_p10 }
  0x30   : > { %p1749_p5 = pneg %p1748_p0 }
  0x31   : > { %1604 = dma.hbm_to_vmem [thread:$0]  (!%p2123_p11), %s2554_s1, 128, %s318_s23, [#allocation6], %s2523_s28, %s2523_s28, %s2525_s29  }
  0x32   : > { %p1756_p9 = pnand %p1755_p7, %p1749_p5 }
  0x34   : > { %1759 = shalt.err (!%p1756_p9)
}
  0x35   : > { %s2555_s3 = sld [smem:[#allocation31_spill]]  ;;  %s2149_s23 = sadd.s32 1, %s2004_s16  }
  0x36   : > { %2556 = sst [smem:[#allocation26_spill]] %s2149_s23  ;;  %s41_s25 = sadd.s32 1, %s2000_s15 }
  0x37   : > { %s38_s27 = ssub.s32 %s2004_s16, %s2149_s23  ;;  %p48_p13 = scmp.ne.s32.totalorder %s2000_s15, %s1996_s14 }
  0x38   : > { %p39_p0 = scmp.eq.s32.totalorder %s38_s27, 0  ;;  %p49_p5 = scmp.eq.s32.totalorder %s2004_s16, 0 }
  0x39   : > { %p2159_p10 = por %p292_p2, %p48_p13  ;;  %p1635_p3 = scmp.lt.s32.totalorder %s2004_s16, 2 }
  0x3a   : > { %s2165_s11 = scalar_select %p39_p0, %s2000_s15, %s41_s25  }
  0x3b   : > { %1610 = dma.hbm_to_vmem [thread:$0]  (!%p2123_p11), %s2555_s3, 128, %s345_s26, [#allocation9]  }
  0x3c   : > { %s2557_s30 = scalar_select %p2159_p10, 1, 0 }
  0x3d   : > { %2559 = sst [smem:[#allocation28_spill]] %s2165_s11  ;;  %p50_p7 = por %p49_p5, %p48_p13 }
  0x3e   : > { %2558 = sst [smem:[#allocation27_spill]] %s2557_s30  ;;  %s2168_s12 = sand.u32 1, %s2000_s15  }
  0x3f   : > { %s387_s26 = sand.u32 1, %s2004_s16   ;;  %s2172_s18 = sshll.u32 %s2168_s12, 6 }
  0x40   : > { %p2174_p9 = pnand %p1635_p3, %p50_p7  ;;  %s2179_s27 = sshll.u32 %s2004_s16, 10 }
  0x41   : > { %s2561_s5 = sld [smem:[#allocation32_spill]]  ;;  %s391_s1 = scalar_lea.vmem [#allocation11], %s2172_s18 }
  0x42   : > { %s398_s3 = sshll.u32 %s391_s1, 4  ;;  %s2010_s11 = smov [#allocation7]   ;;  %s2188_s3 = int_to_ptr.vmem [resolvable:$true] %s398_s3 }
  0x43   : > { %s2190_s15 = sshll.u32 %s2010_s11, 4  ;;  %s2192_s23 = scalar_lea.sflag [#allocation12], %s387_s26  ;;  %s331_s15 = int_to_ptr.vmem [resolvable:$true] %s2190_s15 }
  0x44   : > { %p2198_p13 = pneg %p2174_p9 }
  0x47   : > { %s2185_s25 = scalar_lea.hbm %s2561_s5, %s2179_s27  ;;  %s1765_s29 = scalar_lea.hbm %s2561_s5, 2048 }
  0x48   : > { %s1760_s20 = scalar_lea.hbm %s2185_s25, 1024  ;;  %p1766_p3 = scmp.lt.s32.totalorder %s2185_s25, %s2561_s5 }
  0x49   : > { %p1761_p2 = scmp.ne.s32.totalorder %s2185_s25, %s1760_s20  ;;  %p1767_p7 = scmp.lt.s32.totalorder %s1765_s29, %s1760_s20 }
  0x4b   : > { %p1763_p0 = pnand %p2198_p13, %p1761_p2  ;;  %p1768_p1 = por %p1767_p7, %p1766_p3 }
  0x4d   : > { %p1764_p5 = pneg %p1763_p0 }
  0x4f   : > { %p1769_p12 = pnand %p1768_p1, %p1764_p5 }
  0x51   : > { %1772 = shalt.err (!%p1769_p12)
}
  0x52   : > { %s1773_s26 = scalar_lea.vmem %s2188_s3, 1024  ;;  %s2011_s30 = smov [#allocation11]  }
  0x53   : > { %p1774_p6 = scmp.ne.s32.totalorder %s2188_s3, %s1773_s26  ;;  %s1778_s28 = sshll.u32 %s2011_s30, 4  ;;  %s1779_s28 = int_to_ptr.vmem [resolvable:$false] %s1778_s28 }
  0x54   : > { %s1780_s1 = scalar_lea.vmem %s1779_s28, 2048  ;;  %p1781_p10 = scmp.lt.s32.totalorder %s2188_s3, %s1779_s28 }
  0x55   : > { %p1776_p2 = pnand %p1774_p6, %p2198_p13  ;;  %p1782_p4 = scmp.lt.s32.totalorder %s1780_s1, %s1773_s26 }
  0x57   : > { %p1777_p0 = pneg %p1776_p2  ;;  %p1783_p8 = por %p1782_p4, %p1781_p10 }
  0x59   : > { %p1784_p11 = pnand %p1783_p8, %p1777_p0 }
  0x5b   : > { %1787 = shalt.err (!%p1784_p11)
}
  0x5c   : > { %s2563_s10 = smov 4   ;;  %s2564_s20 = smov 64  }
  0x5d   : > { %1620 = dma.hbm_to_vmem [thread:$0]  (!%p2174_p9), %s2185_s25, 1024, %s2188_s3, %s2192_s23, %s2564_s20, %s2564_s20, %s2563_s10  }
  0x5e   : > { %s1799_s30 = scalar_lea.vmem %s331_s15, 128  ;;  %p2565_p6 = scmp.ne.s32.totalorder %s2553_s24, 0 }
  0x5f   : > { %p1800_p1 = scmp.ne.s32.totalorder %s331_s15, %s1799_s30  ;;  %p1807_p8 = scmp.lt.s32.totalorder %s331_s15, %s331_s15 }
  0x60   : > { %p2566_p12 = pneg %p2565_p6  ;;  %p1808_p11 = scmp.lt.s32.totalorder %s1799_s30, %s1799_s30 }
  0x62   : > { %p1802_p5 = pnand %p1800_p1, %p2566_p12  ;;  %p1809_p10 = por %p1808_p11, %p1807_p8 }
  0x64   : > { %p1803_p4 = pneg %p1802_p5 }
  0x66   : > { %p1810_p3 = pnand %p1809_p10, %p1803_p4 }
  0x68   : > { %1813 = shalt.err (!%p1810_p3)
}
  0x69   : > { %s2567_s2 = sld [smem:[#allocation30_spill]]  ;;  %s2012_s3 = smov [#allocation10]  }
  0x6a   : > { %s355_s25 = sshll.u32 %s2012_s3, 4  ;;  %s1387_s26 = sshll.u32 %s2168_s12, 3  ;;  %s356_s25 = int_to_ptr.vmem [resolvable:$true] %s355_s25 }
  0x6b   : > { %s1825_s28 = scalar_lea.vmem %s356_s25, 128  ;;  %p2568_p2 = pmov %p2566_p12 }
  0x6c   : > { %p1826_p7 = scmp.ne.s32.totalorder %s356_s25, %s1825_s28  ;;  %p1833_p12 = scmp.lt.s32.totalorder %s356_s25, %s356_s25 }
  0x6d   : > { %p1834_p5 = scmp.lt.s32.totalorder %s1825_s28, %s1825_s28 }
  0x6e   : > { %p1828_p0 = pnand %p1826_p7, %p2568_p2 }
  0x6f   : > { %1607 = dma.hbm_to_vmem [thread:$0]  (!%p2565_p6), %s2567_s2, 128, %s331_s15, [#allocation6], %s2564_s20, %s2564_s20, %s2563_s10  }
  0x70   : > { %p1829_p1 = pneg %p1828_p0  ;;  %p1835_p4 = por %p1834_p5, %p1833_p12 }
  0x72   : > { %p1836_p8 = pnand %p1835_p4, %p1829_p1 }
  0x74   : > { %1839 = shalt.err (!%p1836_p8)
}
  0x75   : > { %1613 = dma.hbm_to_vmem [thread:$0]  (!%p2565_p6), %s2516_s4, 128, %s356_s25, [#allocation9]  }
  0x76   : > { %s1447_s15 = sshll.u32 %s2004_s16, 7  ;;  %s370_s28 = scalar_lea.vmem [#allocation2], %s1387_s26 }
  0x77   : > { %s2249_s3 = scalar_lea.hbm %s2512_s0, %s1447_s15  ;;  %s377_s2 = sshll.u32 %s370_s28, 4  ;;  %s2251_s2 = int_to_ptr.vmem [resolvable:$true] %s377_s2 }
  0x78   : > { %s367_s24 = scalar_lea.sflag [#allocation3], %s2168_s12  ;;  %s1840_s5 = scalar_lea.hbm %s2249_s3, 128 }
  0x79   : > { %p1841_p11 = scmp.ne.s32.totalorder %s2249_s3, %s1840_s5  ;;  %s1845_s30 = scalar_lea.hbm %s2512_s0, 256 }
  0x7a   : > { %p1846_p6 = scmp.lt.s32.totalorder %s2249_s3, %s2512_s0  ;;  %p1847_p7 = scmp.lt.s32.totalorder %s1845_s30, %s1840_s5 }
  0x7b   : > { %p1843_p10 = pnand %p1841_p11, %p2198_p13 }
  0x7c   : > { %p1848_p2 = por %p1847_p7, %p1846_p6 }
  0x7d   : > { %p1844_p3 = pneg %p1843_p10 }
  0x7f   : > { %p1849_p0 = pnand %p1848_p2, %p1844_p3 }
  0x81   : > { %1852 = shalt.err (!%p1849_p0)
}
  0x82   : > { %s1853_s26 = scalar_lea.vmem %s2251_s2, 128  ;;  %s2013_s11 = smov [#allocation2]  }
  0x83   : > { %p1854_p1 = scmp.ne.s32.totalorder %s2251_s2, %s1853_s26  ;;  %s1858_s28 = sshll.u32 %s2013_s11, 4  ;;  %s1859_s28 = int_to_ptr.vmem [resolvable:$false] %s1858_s28 }
  0x84   : > { %s1860_s25 = scalar_lea.vmem %s1859_s28, 256  ;;  %p1861_p4 = scmp.lt.s32.totalorder %s2251_s2, %s1859_s28 }
  0x85   : > { %p1856_p12 = pnand %p1854_p1, %p2198_p13  ;;  %p1862_p8 = scmp.lt.s32.totalorder %s1860_s25, %s1853_s26 }
  0x87   : > { %p1857_p5 = pneg %p1856_p12  ;;  %p1863_p11 = por %p1862_p8, %p1861_p4 }
  0x89   : > { %p1864_p10 = pnand %p1863_p11, %p1857_p5 }
  0x8b   : > { %1867 = shalt.err (!%p1864_p10)
}
  0x8c   : > { %1617 = dma.hbm_to_vmem [thread:$0]  (!%p2174_p9), %s2249_s3, 128, %s2251_s2, %s367_s24, %s2564_s20, %s2564_s20, %s2563_s10  }
  0x8d   : > { %s2281_s30 = scalar_lea.hbm %s2519_s7, %s2179_s27  ;;  %s418_s29 = scalar_lea.vmem [#allocation13], %s2172_s18 }
  0x8e   : > { %s425_s15 = sshll.u32 %s418_s29, 4  ;;  %s1868_s26 = scalar_lea.hbm %s2281_s30, 1024  ;;  %s426_s15 = int_to_ptr.vmem [resolvable:$true] %s425_s15 }
  0x8f   : > { %p1869_p3 = scmp.ne.s32.totalorder %s2281_s30, %s1868_s26  ;;  %s1873_s2 = scalar_lea.hbm %s2519_s7, 2048 }
  0x90   : > { %p1874_p2 = scmp.lt.s32.totalorder %s2281_s30, %s2519_s7  ;;  %p1875_p0 = scmp.lt.s32.totalorder %s1873_s2, %s1868_s26 }
  0x91   : > { %p1871_p6 = pnand %p1869_p3, %p2198_p13 }
  0x92   : > { %p1876_p1 = por %p1875_p0, %p1874_p2 }
  0x93   : > { %p1872_p7 = pneg %p1871_p6 }
  0x95   : > { %p1877_p12 = pnand %p1876_p1, %p1872_p7 }
  0x97   : > { %1880 = shalt.err (!%p1877_p12)
}
  0x98   : > { %s1881_s25 = scalar_lea.vmem %s426_s15, 1024  ;;  %s2014_s5 = smov [#allocation13]  }
  0x99   : > { %p1882_p5 = scmp.ne.s32.totalorder %s426_s15, %s1881_s25  ;;  %s1886_s1 = sshll.u32 %s2014_s5, 4  ;;  %s1887_s1 = int_to_ptr.vmem [resolvable:$false] %s1886_s1 }
  0x9a   : > { %s1888_s29 = scalar_lea.vmem %s1887_s1, 2048  ;;  %p1889_p11 = scmp.lt.s32.totalorder %s426_s15, %s1887_s1 }
  0x9b   : > { %p1884_p4 = pnand %p1882_p5, %p2198_p13  ;;  %p1890_p10 = scmp.lt.s32.totalorder %s1888_s29, %s1881_s25 }
  0x9d   : > { %p1885_p8 = pneg %p1884_p4  ;;  %p1891_p3 = por %p1890_p10, %p1889_p11 }
  0x9f   : > { %p1892_p6 = pnand %p1891_p3, %p1885_p8 }
  0xa1   : > { %1895 = shalt.err (!%p1892_p6)
}
  0xa2   : > { %1623 = dma.hbm_to_vmem [thread:$0]  (!%p2174_p9), %s2281_s30, 1024, %s426_s15, %s2192_s23, %s2564_s20, %s2564_s20, %s2563_s10  }
  0xa3   : > { %s2308_s28 = scalar_lea.hbm %s2520_s8, %s2179_s27  ;;  %s439_s2 = scalar_lea.vmem [#allocation14], %s2172_s18 }
  0xa4   : > { %s446_s3 = sshll.u32 %s439_s2, 4  ;;  %s436_s24 = scalar_lea.sflag [#allocation15], %s2168_s12  ;;  %s2311_s3 = int_to_ptr.vmem [resolvable:$true] %s446_s3 }
  0xa5   : > { %s1896_s25 = scalar_lea.hbm %s2308_s28, 1024  ;;  %s1901_s30 = scalar_lea.hbm %s2520_s8, 2048 }
  0xa6   : > { %p1897_p7 = scmp.ne.s32.totalorder %s2308_s28, %s1896_s25  ;;  %p1902_p1 = scmp.lt.s32.totalorder %s2308_s28, %s2520_s8 }
  0xa7   : > { %p1903_p12 = scmp.lt.s32.totalorder %s1901_s30, %s1896_s25 }
  0xa8   : > { %p1899_p2 = pnand %p1897_p7, %p2198_p13 }
  0xa9   : > { %p1904_p5 = por %p1903_p12, %p1902_p1 }
  0xaa   : > { %p1900_p0 = pneg %p1899_p2 }
  0xac   : > { %p1905_p4 = pnand %p1904_p5, %p1900_p0 }
  0xae   : > { %1908 = shalt.err (!%p1905_p4)
}
  0xaf   : > { %s1909_s12 = scalar_lea.vmem %s2311_s3, 1024  ;;  %s2015_s18 = smov [#allocation14]  }
  0xb0   : > { %p1910_p8 = scmp.ne.s32.totalorder %s2311_s3, %s1909_s12  ;;  %s1914_s1 = sshll.u32 %s2015_s18, 4  ;;  %s1915_s1 = int_to_ptr.vmem [resolvable:$false] %s1914_s1 }
  0xb1   : > { %s1916_s29 = scalar_lea.vmem %s1915_s1, 2048  ;;  %p1917_p3 = scmp.lt.s32.totalorder %s2311_s3, %s1915_s1 }
  0xb2   : > { %p1912_p11 = pnand %p1910_p8, %p2198_p13  ;;  %p1918_p6 = scmp.lt.s32.totalorder %s1916_s29, %s1909_s12 }
  0xb4   : > { %p1913_p10 = pneg %p1912_p11  ;;  %p1919_p7 = por %p1918_p6, %p1917_p3 }
  0xb6   : > { %p1920_p2 = pnand %p1919_p7, %p1913_p10 }
  0xb8   : > { %1923 = shalt.err (!%p1920_p2)
}
  0xb9   : > { %1626 = dma.hbm_to_vmem [thread:$0]  (!%p2174_p9), %s2308_s28, 1024, %s2311_s3, %s436_s24, %s2564_s20, %s2564_s20, %s2563_s10  }
  0xba   : > { %p2569_p13 = scmp.ne.s32.totalorder %s2552_s21, 0 }
  0xbb   : > { %s2340_s13 = sand.u32 (!%p2569_p13), 1, %s1996_s14   ;;  %p2570_p0 = scmp.ne.s32.totalorder (!%p2569_p13), %s2549_s19, 0 }
  0xbc   : > { %464 = sbr.rel (%p2569_p13) target bundleno = 1265 (0x4f1), region = 60  ;;  %s1400_s26 = sshll.u32 (!%p2569_p13), %s2340_s13, 3 }
  0xbd   : > { %s467_s11 = scalar_lea.sflag (!%p2569_p13), [#allocation3], %s2340_s13  ;;  %s2344_s2 = scalar_lea.vmem (!%p2569_p13), [#allocation2], %s1400_s26 }
  0xc1   : > { %1967 = dma.done.wait (%p2570_p0), %s467_s11, 128  }
  0xc2   : > { %1969 = vsyncadd (%p2570_p0), %s467_s11, 4294967168  ;;  %p2571_p9 = scmp.eq.s32.totalorder %s2095_s17, 0 }
  0xc4   : > { %1971 = dma.done.wait (%p2571_p9), [#allocation6], 256   ;;  %p2572_p1 = pmov %p2571_p9 }
  0xc6   : > { %1973 = vsyncadd (%p2572_p1), [#allocation6], 4294967040  ;;  %p2573_p12 = pmov %p2572_p1 }
  0xc7   : > { %p2574_p5 = pmov %p2572_p1 }
  0xc8   : > { %1975 = dma.done.wait (%p2573_p12), [#allocation9], 256  }
  0xc9   : > { %1977 = vsyncadd (%p2574_p5), [#allocation9], 4294967040  ;;  %s491_s21 = sand.u32 1, %s2095_s17   ;;  %s1405_s22 = sshll.u32 %s2340_s13, 6 }
  0xca   : > { %s492_s10 = scalar_lea.sflag [#allocation12], %s491_s21  ;;  %s2360_s20 = scalar_lea.vmem [#allocation11], %s1405_s22 }
  0xcb   : > { %1979 = dma.done.wait (%p2570_p0), %s492_s10, 2048  }
  0xcc   : > { %1981 = vsyncadd (%p2570_p0), %s492_s10, 4294965248  ;;  %s2366_s28 = scalar_lea.vmem [#allocation13], %s1405_s22  ;;  %s510_s3 = scalar_lea.sflag [#allocation15], %s2340_s13 }
  0xcd   : > { %s2369_s24 = scalar_lea.vmem [#allocation14], %s1405_s22 }
  0xce   : > { %1983 = dma.done.wait (%p2570_p0), %s510_s3, 1024  }
  0xcf   : > { %1985 = vsyncadd (%p2570_p0), %s510_s3, 4294966272  ;;  %v2016_v0 = vmov 0.0   ;;  %vm2017_vm0 = vmmov 0   ;;  %v1681_v1 = vld [vmem:[%s2360_s20 + $0x38] sm:$0xff]   ;;  %v1682_v2 = vld [vmem:[%s2360_s20 + $0x30] sm:$0xff]   ;;  %vm706_vm1 = vcmask 130048  }
  0xd0   : > { %1489 = vmatprep.subr.bf16.mxu0 %v2016_v0  ;;  %1505 = vmatprep.mubr.msk.bf16.mxu0 %vm2017_vm0, %v2016_v0  ;;  %v1683_v3 = vld [vmem:[%s2360_s20 + $0x28] sm:$0xff]   ;;  %v1684_v4 = vld [vmem:[%s2360_s20 + $0x20] sm:$0xff]   ;;  %v1685_v5 = vld [vmem:[%s2360_s20 + $0x18] sm:$0xff]   ;;  %p571_p4 = scmp.lt.s32.totalorder %s2095_s17, 1  ;;  %s2575_s12 = sld [smem:[#allocation27_spill]] }
  0xd1   : > { %1509 = vmatprep.subr.bf16.mxu1 %v2016_v0  ;;  %1511 = vmatprep.mubr.msk.bf16.mxu1 %vm2017_vm0, %v2016_v0  ;;  %v1686_v6 = vld [vmem:[%s2360_s20 + $0x10] sm:$0xff]   ;;  %v1687_v7 = vld [vmem:[%s2360_s20 + $0x8] sm:$0xff]   ;;  %v1688_v8 = vld [vmem:[%s2360_s20] sm:$0xff]   ;;  %s1408_s18 = sshll.u32 %s2340_s13, 4  ;;  %s1451_s26 = sshll.u32 %s2095_s17, 8 }
  0xd2   : > { %1490 = vmatpush3.bf16.msra.mxu0 %v1681_v1  ;;  %v1689_v9 = vld [vmem:[#allocation5] sm:$0xff]   ;;  %v1693_v10 = vld [vmem:[%s2366_s28 + $0x38] sm:$0xff]   ;;  %v1695_v11 = vld [vmem:[%s2366_s28 + $0x30] sm:$0xff]   ;;  %s2442_s19 = scalar_select %p571_p4, %s2095_s17, 1 }
  0xd3   : > { %1491 = vmatprep.subr.bf16.mxu0 %v2016_v0  ;;  %v1697_v12 = vld [vmem:[%s2366_s28 + $0x28] sm:$0xff]   ;;  %v1699_v13 = vld [vmem:[%s2366_s28 + $0x20] sm:$0xff]   ;;  %v1701_v14 = vld [vmem:[%s2366_s28 + $0x18] sm:$0xff]   ;;  %s570_s1 = scalar_lea.vmem [#allocation16], %s1408_s18  ;;  %s2576_s21 = sld [smem:[#allocation33_spill]] }
  0xd4   : > { %v2410_v20 = vld [vmem:[%s2344_s2] sm:$0xff]   ;;  %v1694_v23 = vld [vmem:[%s2369_s24 + $0x28] sm:$0xff]   ;;  %v1696_v24 = vld [vmem:[%s2369_s24 + $0x20] sm:$0xff]   ;;  %s573_s23 = scalar_lea.vmem %s2518_s6, %s2442_s19  ;;  %s576_s27 = scalar_lea.vmem %s2521_s9, %s2442_s19 }
  0xd5   : > { %v1691_v21 = vld [vmem:[%s2369_s24 + $0x38] sm:$0xff]   ;;  %v1692_v22 = vld [vmem:[%s2369_s24 + $0x30] sm:$0xff]   ;;  %v1702_v27 = vld [vmem:[%s2369_s24 + $0x8] sm:$0xff]   ;;  %s1188_s29 = sshll.u32 %s570_s1, 4  ;;  %s1174_s10 = scalar_lea.sflag [#allocation4], %s2340_s13  ;;  %s2466_s29 = int_to_ptr.vmem [resolvable:$true] %s1188_s29 }
  0xd6   : > { %1492 = vmatpush3.bf16.msra.mxu0 %v1682_v2  ;;  %v1698_v25 = vld [vmem:[%s2369_s24 + $0x18] sm:$0xff]   ;;  %v1700_v26 = vld [vmem:[%s2369_s24 + $0x10] sm:$0xff]   ;;  %v1704_v29 = vld [vmem:[%s2369_s24] sm:$0xff]   ;;  %s1924_s20 = scalar_lea.vmem %s2466_s29, 256  ;;  %p2577_p11 = scmp.ne.s32.totalorder %s2575_s12, 0 }
  0xd7   : > { %1493 = vmatprep.subr.bf16.mxu0 %v2016_v0  ;;  %v1703_v28 = vld [vmem:[%s2366_s28 + $0x10] sm:$0xff]   ;;  %v1705_v30 = vld [vmem:[%s2366_s28 + $0x8] sm:$0xff]   ;;  %v1707_v32 = vld [vmem:[%s2366_s28] sm:$0xff]   ;;  %p1925_p8 = scmp.ne.s32.totalorder %s2466_s29, %s1924_s20  ;;  %s2018_s17 = smov [#allocation16]  }
  0xd8   : > { %v1706_v31 = vld [vmem:[#allocation7] sm:$0xff]   ;;  %v1418_v33 = vld [vmem:[%s573_s23] ss:$0 sm:$0xff]  ;;  %v1098_v1 = vld [vmem:[#allocation10] sm:$0xff]  ;;  %s1928_s28 = sshll.u32 %s2018_s17, 4  ;;  %s1929_s28 = int_to_ptr.vmem [resolvable:$false] %s1928_s28 }
  0xd9   : > { %v1438_v55 = vld [vmem:[%s576_s27] ss:$0 sm:$0xff]  ;;  %s2471_s22 = scalar_lea.hbm %s2576_s21, %s1451_s26  ;;  %p1926_p10 = pnand %p1925_p8, %p2577_p11 }
  0xda   : > { %1494 = vmatpush3.bf16.msra.mxu0 %v1683_v3  ;;  %v1023_v63 = vld [vmem:[#allocation8] sm:$0xff]  ;;  %s1930_s3 = scalar_lea.vmem %s1929_s28, 512  ;;  %p1931_p6 = scmp.lt.s32.totalorder %s2466_s29, %s1929_s28 }
  0xdb   : > { %1495 = vmatprep.subr.bf16.mxu0 %v2016_v0  ;;  %p1927_p3 = pneg %p1926_p10  ;;  %p1932_p7 = scmp.lt.s32.totalorder %s1930_s3, %s1924_s20 }
  0xdd   : > { %p1933_p2 = por %p1932_p7, %p1931_p6 }
  0xde   : > { %1496 = vmatpush3.bf16.msra.mxu0 %v1684_v4 }
  0xdf   : > { %1497 = vmatprep.subr.bf16.mxu0 %v2016_v0  ;;  %p1934_p13 = pnand %p1933_p2, %p1927_p3 }
  0xe2   : > { %1498 = vmatpush3.bf16.msra.mxu0 %v1685_v5 }
  0xe3   : > { %1499 = vmatprep.subr.bf16.mxu0 %v2016_v0 }
  0xe6   : > { %1500 = vmatpush3.bf16.msra.mxu0 %v1686_v6 }
  0xe7   : > { %1501 = vmatprep.subr.bf16.mxu0 %v2016_v0 }
  0xea   : > { %1502 = vmatpush3.bf16.msra.mxu0 %v1687_v7 }
  0xeb   : > { %1503 = vmatprep.subr.bf16.mxu0 %v2016_v0 }
  0xee   : > { %1504 = vmatpush3.bf16.msra.mxu0 %v1688_v8 }
  0xef   : > { %1535 = vmatprep.subr.bf16.mxu0 %v2016_v0 }
  0xf1   : > { %1506 = vmatmul.mubr.bf16.vlgmr.msra.gmra.mxu0 %v1689_v9 }
  0xf2   : > { %1551 = vmatprep.mubr.msk.bf16.mxu0 %vm2017_vm0, %v2016_v0  ;;  %1536 = vmatpush3.bf16.msra.mxu0 %v1693_v10 }
  0xf3   : > { %1537 = vmatprep.subr.bf16.mxu0 %v2016_v0 }
  0xf6   : > { %1538 = vmatpush3.bf16.msra.mxu0 %v1695_v11 }
  0xf7   : > { %1539 = vmatprep.subr.bf16.mxu0 %v2016_v0 }
  0xfa   : > { %1540 = vmatpush3.bf16.msra.mxu0 %v1697_v12 }
  0xfb   : > { %1541 = vmatprep.subr.bf16.mxu0 %v2016_v0 }
  0xfe   : > { %1542 = vmatpush3.bf16.msra.mxu0 %v1699_v13 }
  0xff   : > { %1543 = vmatprep.subr.bf16.mxu0 %v2016_v0 }
 0x102   : > { %1544 = vmatpush3.bf16.msra.mxu0 %v1701_v14 }
 0x103   : > { %1545 = vmatprep.subr.bf16.mxu0 %v2016_v0 }
 0x106   : > { %1546 = vmatpush3.bf16.msra.mxu0 %v1703_v28 }
 0x107   : > { %1547 = vmatprep.subr.bf16.mxu0 %v2016_v0 }
 0x10a   : > { %1548 = vmatpush3.bf16.msra.mxu0 %v1705_v30 }
 0x10b   : > { %1549 = vmatprep.subr.bf16.mxu0 %v2016_v0 }
 0x10e   : > { %1550 = vmatpush3.bf16.msra.mxu0 %v1707_v32 }
 0x1b1   : > { %v686_v15 = vpop.f32.mrf.mxu0 }
 0x1b3   : > { %v1507_v16 = vpop.f32.mrf.mxu0 }
 0x1b5   : > { %v689_v17 = vpop.f32.mrf.mxu0 }
 0x1b6   : > { %v693_v18 = vpack.c.bf16 %v689_v17, %v686_v15 }
 0x1b7   : > { %v1508_v19 = vpop.f32.mrf.mxu0 }
 0x1b8   : > { %1510 = vmatpush3.bf16.msra.mxu1 %v693_v18 }
 0x1b9   : > { %1515 = vmatprep.subr.bf16.mxu1 %v2016_v0 }
 0x1bb   : > { %1512 = vmatmul.mubr.msk.bf16.vlgmr.msra.gmra.mxu1 %vm706_vm1, %v2410_v20 }
 0x1bc   : > { %1516 = vmatpush3.bf16.msra.mxu1 %v1691_v21  ;;  %1531 = vmatprep.mubr.msk.bf16.mxu1 %vm2017_vm0, %v2016_v0 }
 0x1bd   : > { %1517 = vmatprep.subr.bf16.mxu1 %v2016_v0 }
 0x1c0   : > { %1518 = vmatpush3.bf16.msra.mxu1 %v1692_v22 }
 0x1c1   : > { %1519 = vmatprep.subr.bf16.mxu1 %v2016_v0 }
 0x1c4   : > { %1520 = vmatpush3.bf16.msra.mxu1 %v1694_v23 }
 0x1c5   : > { %1521 = vmatprep.subr.bf16.mxu1 %v2016_v0 }
 0x1c8   : > { %1522 = vmatpush3.bf16.msra.mxu1 %v1696_v24 }
 0x1c9   : > { %1523 = vmatprep.subr.bf16.mxu1 %v2016_v0 }
 0x1cc   : > { %1524 = vmatpush3.bf16.msra.mxu1 %v1698_v25 }
 0x1cd   : > { %1525 = vmatprep.subr.bf16.mxu1 %v2016_v0 }
 0x1d0   : > { %1526 = vmatpush3.bf16.msra.mxu1 %v1700_v26 }
 0x1d1   : > { %1527 = vmatprep.subr.bf16.mxu1 %v2016_v0 }
 0x1d4   : > { %1528 = vmatpush3.bf16.msra.mxu1 %v1702_v27 }
 0x1d5   : > { %1529 = vmatprep.subr.bf16.mxu1 %v2016_v0 }
 0x1d8   : > { %1530 = vmatpush3.bf16.msra.mxu1 %v1704_v29 }
 0x1d9   : > { %1555 = vmatprep.subr.bf16.mxu1 %v2016_v0 }
 0x1db   : > { %1532 = vmatmul.mubr.bf16.vlgmr.msra.gmra.mxu1 %v1706_v31 }
 0x1dc   : > { %1557 = vmatprep.mubr.msk.bf16.mxu1 %vm2017_vm0, %v2016_v0 }
 0x27b   : > { %v744_v34 = vpop.f32.mrf.mxu1 }
 0x27c   : > { %v745_v36 = vadd.f32 %v1418_v33, %v744_v34 }
 0x27d   : > { %v1513_v35 = vpop.f32.mrf.mxu1 }
 0x27e   : > { %v751_v40 = vmax.f32 %v745_v36, 0.0 }
 0x27f   : > { %v747_v37 = vpop.f32.mrf.mxu1 }
 0x280   : > { %v748_v38 = vadd.f32 %v1418_v33, %v747_v37 }
 0x281   : > { %v1514_v39 = vpop.f32.mrf.mxu1 }
 0x282   : > { %v752_v41 = vmax.f32 %v748_v38, 0.0 }
 0x284   : > { %v753_v42 = vpack.c.bf16 %v752_v41, %v751_v40 }
 0x286   : > { %1552 = vmatmul.mubr.bf16.vlgmr.msra.gmra.mxu0 %v753_v42 }
 0x29b   : > { %v876_v43 = vpop.f32.mrf.mxu1 }
 0x29d   : > { %v1533_v44 = vpop.f32.mrf.mxu1 }
 0x29f   : > { %v879_v45 = vpop.f32.mrf.mxu1 }
 0x2a1   : > { %v1534_v46 = vpop.f32.mrf.mxu1 }
 0x346   : > { %v965_v47 = vpop.f32.mrf.mxu0 }
 0x347   : > { %v966_v50 = vadd.f32 %v965_v47, %v876_v43 }
 0x348   : > { %v1553_v48 = vpop.f32.mrf.mxu0 }
 0x34a   : > { %v968_v49 = vpop.f32.mrf.mxu0 }
 0x34b   : > { %v969_v51 = vadd.f32 %v968_v49, %v879_v45 }
 0x34c   : > { %v1554_v52 = vpop.f32.mrf.mxu0 }
 0x34d   : > { %v972_v53 = vpack.c.bf16 %v969_v51, %v966_v50 }
 0x34f   : > { %1556 = vmatpush3.bf16.msra.mxu1 %v972_v53 }
 0x350   : > { %1561 = vmatprep.subr.mxu1 %v2016_v0 }
 0x352   : > { %1558 = vmatmul.mubr.msk.bf16.vlgmr.msra.gmra.mxu1 %vm706_vm1, %v2410_v20 }
 0x353   : > { %1565 = vmatprep.mubr.msk.f32.mxu1 %vm2017_vm0, %v2016_v0 }
 0x412   : > { %v1014_v54 = vpop.f32.mrf.mxu1 }
 0x413   : > { %v1015_v58 = vadd.f32 %v1438_v55, %v1014_v54 }
 0x414   : > { %v1559_v56 = vpop.f32.mrf.mxu1 }
 0x415   : > { %v1021_v62 = vmax.f32 %v1015_v58, 0.0 }
 0x416   : > { %v1017_v57 = vpop.f32.mrf.mxu1 }
 0x417   : > { %v1018_v59 = vadd.f32 %v1438_v55, %v1017_v57 }
 0x418   : > { %v1560_v60 = vpop.f32.mrf.mxu1 }
 0x419   : > { %v1022_v61 = vmax.f32 %v1018_v59, 0.0 }
 0x41b   : > { %1562 = vmatpush3.msra.mxu1 %v1022_v61 }
 0x41c   : > { %1563 = vmatprep.subr.mxu1 %v2016_v0 }
 0x41d   : > { %1564 = vmatpush3.msra.mxu1 %v1021_v62 }
 0x41e   : > { %1568 = vmatprep.subr.mxu1 %v2016_v0  ;;  %1566 = vmatmul.mubr.msk.f32.vlgmr.msra.gmra.mxu1 %vm706_vm1, %v1023_v63 }
 0x41f   : > { %1569 = vmatpush3.msra.mxu1 %v748_v38  ;;  %1572 = vmatprep.mubr.msk.f32.mxu1 %vm2017_vm0, %v2016_v0 }
 0x420   : > { %1570 = vmatprep.subr.mxu1 %v2016_v0 }
 0x421   : > { %1571 = vmatpush3.msra.mxu1 %v745_v36 }
 0x422   : > { %1573 = vmatmul.mubr.msk.f32.vlgmr.msra.gmra.mxu1 %vm706_vm1, %v1098_v1 }
 0x4de   : > { %v1093_v2 = vpop.f32.mrf.mxu1 }
 0x4df   : > { %1097 = vst [vmem:[%s570_s1] sm:$0xff] %v1093_v2 }
 0x4e0   : > { %v1567_v3 = vpop.f32.mrf.mxu1 }
 0x4e2   : > { %v1168_v0 = vpop.f32.mrf.mxu1 }
 0x4e3   : > { %1172 = vst [vmem:[%s570_s1 + $0x8] sm:$0xff] %v1168_v0 }
 0x4e4   : > { %v1574_v4 = vpop.f32.mrf.mxu1 }
 0x4e5   : > { %1937 = shalt.err (!%p1934_p13)
}
 0x4e6   : > { %s1938_s24 = scalar_lea.hbm %s2471_s22, 256  ;;  %s1942_s25 = scalar_lea.hbm %s2576_s21, 512 }
 0x4e7   : > { %p1939_p0 = scmp.ne.s32.totalorder %s2471_s22, %s1938_s24  ;;  %p1943_p12 = scmp.lt.s32.totalorder %s2471_s22, %s2576_s21 }
 0x4e8   : > { %p1944_p5 = scmp.lt.s32.totalorder %s1942_s25, %s1938_s24 }
 0x4e9   : > { %p1940_p9 = pnand %p1939_p0, %p2577_p11 }
 0x4ea   : > { %p1945_p4 = por %p1944_p5, %p1943_p12 }
 0x4eb   : > { %p1941_p1 = pneg %p1940_p9 }
 0x4ed   : > { %p1946_p8 = pnand %p1945_p4, %p1941_p1 }
 0x4ef   : > { %1949 = shalt.err (!%p1946_p8)
}
 0x4f0   : > { %1599 = dma.vmem_to_hbm [thread:$0]  (%p2577_p11), %s2466_s29, 256, %s2471_s22, %s1174_s10  }
 0x4f1 PF: > { %s2578_s30 = sld [smem:[#allocation23_spill]]  ;;  %p2581_p3 = scmp.ge.s32.totalorder %s2004_s16, 2 }
 0x4f2   : > { %s2579_s15 = sld [smem:[#allocation25_spill]] }
 0x4f7   : > { %s1200_s27 = sand.u32 1, %s2578_s30  }
 0x4f8   : > { %p2580_p10 = scmp.ne.s32.totalorder %s2579_s15, 0  ;;  %s1201_s18 = scalar_lea.sflag [#allocation4], %s1200_s27 }
 0x4fa   : > { %p1628_p6 = pnand %p2581_p3, %p2580_p10 }
 0x4fc   : > { %p1629_p7 = pneg %p1628_p6 }
 0x4fe   : > { %1987 = dma.done.wait (%p1629_p7), %s1201_s18, 256  }
 0x4ff   : > { %1989 = vsyncadd (%p1629_p7), %s1201_s18, 4294967040  ;;  %s2582_s16 = sld [smem:[#allocation26_spill]]  ;;  %s2585_s13 = smov %s1996_s14 }
 0x500   : > { %s2583_s1 = sld [smem:[#allocation24_spill]] }
 0x501   : > { %s2584_s15 = sld [smem:[#allocation28_spill]] }
 0x505   : > { %p31_p2 = scmp.ge.s32.totalorder %s2582_s16, 4  }
 0x506   : > { %s2586_s14 = smov %s2583_s1 }
 0x507   :  { %33 = sbr.rel (!%p31_p2) target bundleno = 17 (0x11), region = 164 }
 0x50c   :  { %1206 = vsyncpa [#allocation3], 1 }
 0x50d   :  { %1208 = vsyncpa [#allocation3 + $0x1], 1 }
 0x50e   :  { %1209 = vsyncpa [#allocation6], 1 }
 0x50f   :  { %1210 = vsyncpa [#allocation9], 1 }
 0x510   :  { %1211 = vsyncpa [#allocation12], 1 }
 0x511   :  { %1213 = vsyncpa [#allocation12 + $0x1], 1 }
 0x512   :  { %1214 = vsyncpa [#allocation15], 1 }
 0x513   :  { %1216 = vsyncpa [#allocation15 + $0x1], 1 }
 0x514   :  { %1217 = vsyncpa [#allocation4], 1 }
 0x515   :  { %1219 = vsyncpa [#allocation4 + $0x1], 1 }

</bundles_post_ra>
